<compile_context>
chip_gen: v6e
topology: v6e:2x2x1
jax: 0.10.0
libtpu: 0.0.40
codegen_flags: <defaults>
</compile_context>

<pallas_src>
import math

import jax
import jax.numpy as jnp
from jax.experimental import pallas as pl
from jax.experimental.pallas import tpu as pltpu


def _round_up(n, m):
    return ((n + m - 1) // m) * m


def _sinusoidal_pos_emb_kernel(x_ref, fr_ref, out_ref):
    # x_ref:   (TB, 1)    f32  timesteps for this tile
    # fr_ref:  (1, dim)   f32  [freqs, freqs] duplicated row (same every step)
    # out_ref: (TB, dim)  f32
    half_dim = out_ref.shape[-1] // 2
    arg = x_ref[...] * fr_ref[...]                       # (TB,1)*(1,dim) -> (TB,dim)
    lane = jax.lax.broadcasted_iota(jnp.int32, arg.shape, dimension=1)
    # First half of lanes -> sin, second half -> cos; one lane-dense store.
    out_ref[...] = jnp.where(lane < half_dim, jnp.sin(arg), jnp.cos(arg))


def sinusoidal_pos_emb(x, dim, *, block_b=512):
    """x: (...,) array of timesteps -> (..., dim) float32 embedding."""
    assert dim % 2 == 0 and dim >= 4
    half_dim = dim // 2

    orig_shape = x.shape
    b = int(math.prod(orig_shape)) if orig_shape else 1
    x2 = x.reshape(b).astype(jnp.float32).reshape(b, 1)

    # Frequency table computed once outside the kernel; duplicated to full
    # width so the kernel emits a single broadcast multiply + one full store.
    scale = math.log(10000.0) / (half_dim - 1)
    freqs = jnp.exp(jnp.arange(half_dim, dtype=jnp.float32) * (-scale))
    freqs_full = jnp.concatenate([freqs, freqs]).reshape(1, dim)

    # B tile: multiple of 8 (f32 sublane), capped by block_b and by a VMEM
    # budget (~4 MiB per output buffer, double-buffered by the pipeline).
    vmem_cap_rows = max(8, ((4 << 20) // (4 * dim)) // 8 * 8)
    tb = max(8, min(block_b, vmem_cap_rows, _round_up(b, 8)))
    b_pad = _round_up(b, tb)
    if b_pad != b:
        x2 = jnp.pad(x2, ((0, b_pad - b), (0, 0)))
    grid = (b_pad // tb,)

    out = pl.pallas_call(
        _sinusoidal_pos_emb_kernel,
        out_shape=jax.ShapeDtypeStruct((b_pad, dim), jnp.float32),
        grid=grid,
        in_specs=[
            pl.BlockSpec((tb, 1), lambda i: (i, 0)),      # timesteps tile
            pl.BlockSpec((1, dim), lambda i: (0, 0)),     # shared freq row
        ],
        out_specs=pl.BlockSpec((tb, dim), lambda i: (i, 0)),
        compiler_params=pltpu.CompilerParams(
            dimension_semantics=("parallel",),
        ),
        cost_estimate=pl.CostEstimate(
            flops=3 * b_pad * dim,
            transcendentals=2 * b_pad * dim,
            bytes_accessed=4 * (b_pad * (dim + 1) + dim),
        ),
    )(x2, freqs_full)

    if b_pad != b:
        out = out[:b]
    return out.reshape(*orig_shape, dim)


def _reference(x, dim):
    half_dim = dim // 2
    scale = math.log(10000.0) / (half_dim - 1)
    freqs = jnp.exp(jnp.arange(half_dim, dtype=jnp.float32) * (-scale))
    emb = x.astype(jnp.float32)[..., None] * freqs
    return jnp.concatenate([jnp.sin(emb), jnp.cos(emb)], axis=-1)


if __name__ == "__main__":
    key = jax.random.PRNGKey(0)

    # Typical diffusion time-embedding width (lane-dense last dim).
    B, DIM = 64, 128
    x = jax.random.uniform(key, (B,), dtype=jnp.float32, minval=0.0, maxval=1000.0)
    out = sinusoidal_pos_emb(x, DIM)
    jax.block_until_ready(out)
    ref = _reference(x, DIM)
    assert out.shape == (B, DIM)
    assert jnp.allclose(out, ref, atol=1e-5, rtol=1e-5)

    # Ragged (non sublane-aligned) batch and narrow dim, exercising the
    # pad/slice path and the sub-128-lane (full-extent block) output.
    B2, DIM2 = 50, 32
    x2 = jax.random.uniform(
        jax.random.PRNGKey(1), (B2,), dtype=jnp.float32, minval=0.0, maxval=1000.0
    )
    out2 = sinusoidal_pos_emb(x2, DIM2)
    jax.block_until_ready(out2)
    ref2 = _reference(x2, DIM2)
    assert out2.shape == (B2, DIM2)
    assert jnp.allclose(out2, ref2, atol=1e-5, rtol=1e-5)

    print("KERNEL_OK")
</pallas_src>

<mosaic_0001>
module attributes {stable_mosaic.version = 11 : i64} {
  func.func @_sinusoidal_pos_emb_kernel(%arg0: i32, %arg1: memref<64x1xf32, #tpu.memory_space<vmem>>, %arg2: memref<1x128xf32, #tpu.memory_space<vmem>>, %arg3: memref<64x128xf32, #tpu.memory_space<vmem>>) attributes {dimension_semantics = [#tpu.dimension_semantics<parallel>], iteration_bounds = array<i64: 1>, scalar_prefetch = 0 : i64, scratch_operands = 0 : i64, tpu.core_type = #tpu.core_type<tc>, window_params = [{transform_indices = @transform_0, window_bounds = array<i64: 64, 1>}, {pipeline_mode = #tpu.pipeline_mode<synchronous>, transform_indices = @transform_1, window_bounds = array<i64: 1, 128>}, {transform_indices = @transform_2, window_bounds = array<i64: 64, 128>}]} {
    %c0 = arith.constant 0 : index
    %c0_0 = arith.constant 0 : index
    %0 = vector.load %arg1[%c0, %c0_0] : memref<64x1xf32, #tpu.memory_space<vmem>>, vector<64x1xf32>
    %c0_1 = arith.constant 0 : index
    %c0_2 = arith.constant 0 : index
    %1 = vector.load %arg2[%c0_1, %c0_2] : memref<1x128xf32, #tpu.memory_space<vmem>>, vector<1x128xf32>
    %2 = vector.broadcast %0 : vector<64x1xf32> to vector<64x128xf32>
    %3 = vector.broadcast %1 : vector<1x128xf32> to vector<64x128xf32>
    %4 = arith.mulf %2, %3 : vector<64x128xf32>
    %5 = tpu.iota {dimensions = array<i32: 1>} : vector<64x128xi32>
    %c64_i32 = arith.constant 64 : i32
    %6 = vector.broadcast %c64_i32 : i32 to vector<64x128xi32>
    %7 = arith.cmpi slt, %5, %6 : vector<64x128xi32>
    %8 = math.sin %4 : vector<64x128xf32>
    %9 = math.cos %4 : vector<64x128xf32>
    %10 = arith.select %7, %8, %9 : vector<64x128xi1>, vector<64x128xf32>
    %c0_3 = arith.constant 0 : index
    %c0_4 = arith.constant 0 : index
    %11 = vector.load %arg3[%c0_3, %c0_4] : memref<64x128xf32, #tpu.memory_space<vmem>>, vector<64x128xf32>
    tpu.vector_store %arg3[%c0_3, %c0_4], %10 {strides = array<i32>} : memref<64x128xf32, #tpu.memory_space<vmem>>, vector<64x128xf32>,
    return
  }
  func.func @transform_0(%arg0: i32) -> (i32, i32) {
    %c0_i32 = arith.constant 0 : i32
    %c0_i32_0 = arith.constant 0 : i32
    return %arg0, %c0_i32 : i32, i32
  }
  func.func @transform_1(%arg0: i32) -> (i32, i32) {
    %c0_i32 = arith.constant 0 : i32
    %c0_i32_0 = arith.constant 0 : i32
    %c0_i32_1 = arith.constant 0 : i32
    return %c0_i32, %c0_i32_0 : i32, i32
  }
  func.func @transform_2(%arg0: i32) -> (i32, i32) {
    %c0_i32 = arith.constant 0 : i32
    %c0_i32_0 = arith.constant 0 : i32
    return %arg0, %c0_i32 : i32, i32
  }
}

</mosaic_0001>

<bundles_post_ra>
// kernel: tpu_custom_call.1
= control target key start
LH: loop header
LB: loop body
LE: loop exit
PB: predicated region body
PF: predicated region fallthrough
CT: control target
= control target key end

     0   :  { %v1930_v2 = vmov 0   ;;  %s2727_s0 = inlined_call_operand.vmem [shape: f32[64,1], index: 0, kind: input, shape index: {}]   ;;  %s2728_s1 = inlined_call_operand.vmem [shape: f32[1,128], index: 1, kind: input, shape index: {}]   ;;  %s2729_s2 = inlined_call_operand.hbm [shape: f32[64,128], index: 2, kind: output, shape index: {}]  }
   0x1   :  { %v14_v0 = vld [vmem:[%s2727_s0 + $0x10] sm:$0xff]  ;;  %v12_v1 = vld [vmem:[%s2727_s0] sm:$0xff]  ;;  %1874 = vset.pattern.permute.xlu1 %v1930_v2  ;;  %1873 = vset.pattern.permute.xlu0 %v1930_v2  ;;  %v15_v3 = vld [vmem:[%s2727_s0 + $0x18] sm:$0xff] }
   0x2   :  { %33 = vperm.xlu1 %1874, %v14_v0   ;;  %23 = vperm.xlu0 %1873, %v12_v1   ;;  %v13_v4 = vld [vmem:[%s2727_s0 + $0x8] sm:$0xff] }
   0x3   :  { %7 = vsyncpa [#allocation3], 0  ;;  %v17_v5 = vld [vmem:[%s2727_s0 + $0x28] sm:$0xff]  ;;  %v16_v6 = vld [vmem:[%s2727_s0 + $0x20] sm:$0xff]  ;;  %v1931_v44 = vmov 683565275  }
   0x4   :  { %v19_v7 = vld [vmem:[%s2727_s0 + $0x38] sm:$0xff]  ;;  %v18_v8 = vld [vmem:[%s2727_s0 + $0x30] sm:$0xff]  ;;  %v1982_v9 = vld [vmem:[%s2728_s1] ss:$0 sm:$0xff]  ;;  %v1932_v48 = vmov 2475754826  }
   0x5   :  { %v1933_v50 = vmov 2131351028   ;;  %v1934_v52 = vmov 2102212464   ;;  %v1935_v54 = vmov 920167782  }
   0x6   :  { %38 = vperm.xlu1 %1874, %v15_v3   ;;  %28 = vperm.xlu0 %1873, %v13_v4   ;;  %v1936_v61 = vmov 1326507024  }
   0xa   :  { %48 = vperm.xlu1 %1874, %v17_v5   ;;  %43 = vperm.xlu0 %1873, %v16_v6  }
   0xe   :  { %58 = vperm.xlu1 %1874, %v19_v7   ;;  %53 = vperm.xlu0 %1873, %v18_v8  }
  0x7d   :  { %v34_v10 = vpop.permute.xlu1 %33  ;;  %v24_v11 = vpop.permute.xlu0 %23 }
  0x7e   :  { %v1985_v12 = vmul.f32 %v1982_v9, %v34_v10  ;;  %v1988_v13 = vmul.f32 %v1982_v9, %v24_v11 }
  0x80   :  { %v286_v14 = vand.u32 2147483647, %v1985_v12  ;;  %v289_v15 = vand.u32 2139095040, %v1985_v12  ;;  %v78_v16 = vand.u32 2147483647, %v1988_v13  ;;  %v81_v17 = vand.u32 2139095040, %v1988_v13 }
  0x81   :  { %v39_v18 = vpop.permute.xlu1 %38  ;;  %v29_v32 = vpop.permute.xlu0 %28  ;;  %vm288_vm14 = vcmp.lt.s32.totalorder %v1985_v12, 0 }
  0x82   :  { %v290_v19 = vshrl.u32 %v289_v15, 23  ;;  %v1995_v20 = vmul.f32 %v1982_v9, %v39_v18  ;;  %v293_v21 = vand.u32 8388607, %v286_v14  ;;  %v82_v22 = vshrl.u32 %v81_v17, 23 }
  0x83   :  { %v85_v23 = vand.u32 8388607, %v78_v16  ;;  %v2003_v38 = vmul.f32 %v1982_v9, %v29_v32  ;;  %vm2088_vm13 = vcmp.le.f32.partialorder %v286_v14, 0.7853982 }
  0x84   :  { %v1775_v24 = vadd.s32 4294967169, %v290_v19  ;;  %v1767_v25 = vadd.s32 4294967169, %v82_v22  ;;  %v393_v26 = vand.u32 2139095040, %v1995_v20  ;;  %v294_v28 = vor.u32 8388608, %v293_v21 }
  0x85   :  { %v86_v29 = vor.u32 8388608, %v85_v23  ;;  %v390_v42 = vand.u32 2147483647, %v1995_v20 }
  0x86   :  { %v296_v27 = vadd.s32 1, %v1775_v24  ;;  %v88_v30 = vadd.s32 1, %v1767_v25  ;;  %v394_v31 = vshrl.u32 %v393_v26, 23  ;;  %v2005_v39 = vshll.u32 %v294_v28, 8 }
  0x87   :  { %v2009_v41 = vshll.u32 %v86_v29, 8 }
  0x88   :  { %vm297_vm0 = vcmp.gt.s32.totalorder %v296_v27, 0  ;;  %vm89_vm1 = vcmp.gt.s32.totalorder %v88_v30, 0  ;;  %v1779_v34 = vadd.s32 4294967169, %v394_v31 }
  0x89   :  { %v298_v33 = vsel %vm297_vm0, %v296_v27, 0  ;;  %v90_v37 = vsel %vm89_vm1, %v88_v30, 0  ;;  %vm80_vm0 = vcmp.lt.s32.totalorder %v1988_v13, 0 }
  0x8a   :  { %v299_v35 = vshrl.u32 %v298_v33, 5  ;;  %v300_v36 = vand.u32 31, %v298_v33  ;;  %v2007_v40 = vshrl.u32 %v90_v37, 5  ;;  %v92_v46 = vand.u32 31, %v90_v37 }
  0x8b   :  { %v2013_v47 = vadd.s32 1, %v1779_v34 }
  0x8c   :  { %v301_v43 = vsub.s32 32, %v300_v36  ;;  %v303_v45 = vshll.u32 %v1931_v44, %v300_v36  ;;  %v306_v49 = vshll.u32 %v1932_v48, %v300_v36  ;;  %v309_v51 = vshll.u32 %v1933_v50, %v300_v36 }
  0x8d   :  { %v312_v53 = vshll.u32 %v1934_v52, %v300_v36  ;;  %v315_v55 = vshll.u32 %v1935_v54, %v300_v36  ;;  %vm318_vm2 = vcmp.lt.s32.totalorder %v299_v35, 1  ;;  %vm319_vm3 = vcmp.lt.s32.totalorder %v299_v35, 2 }
  0x8e   :  { %v304_v56 = vshrl.u32 %v1932_v48, %v301_v43  ;;  %v307_v57 = vshrl.u32 %v1933_v50, %v301_v43  ;;  %v310_v58 = vshrl.u32 %v1934_v52, %v301_v43  ;;  %v302_v59 = vshrl.u32 %v1931_v44, %v301_v43 }
  0x8f   :  { %v313_v60 = vshrl.u32 %v1935_v54, %v301_v43  ;;  %v316_v62 = vshrl.u32 %v1936_v61, %v301_v43  ;;  %v93_v2 = vsub.s32 32, %v92_v46  ;;  %vm320_vm4 = vcmp.lt.s32.totalorder %v299_v35, 3 }
  0x90   :  { %v305_v63 = vor.u32 %v304_v56, %v303_v45  ;;  %v308_v0 = vor.u32 %v307_v57, %v306_v49  ;;  %v311_v1 = vor.u32 %v310_v58, %v309_v51  ;;  %vm321_vm5 = vcmp.lt.s32.totalorder %v299_v35, 4 }
  0x91   :  { %v314_v3 = vor.u32 %v313_v60, %v312_v53  ;;  %v317_v4 = vor.u32 %v316_v62, %v315_v55  ;;  %v95_v17 = vshll.u32 %v1931_v44, %v92_v46  ;;  %v96_v21 = vshrl.u32 %v1932_v48, %v93_v2 }
  0x92   :  { %v322_v5 = vsel %vm318_vm2, %v302_v59, %v305_v63  ;;  %v323_v6 = vsel %vm321_vm5, %v311_v1, 2102212464  ;;  %v326_v7 = vsel %vm318_vm2, %v305_v63, %v308_v0  ;;  %v330_v8 = vsel %vm318_vm2, %v308_v0, %v311_v1 }
  0x93   :  { %v324_v10 = vsel %vm320_vm4, %v308_v0, %v323_v6  ;;  %v327_v11 = vsel %vm321_vm5, %v314_v3, 920167782  ;;  %v331_v15 = vsel %vm321_vm5, %v317_v4, 1326507024  ;;  %v98_v22 = vshll.u32 %v1932_v48, %v92_v46 }
  0x94   :  { %v328_v18 = vsel %vm320_vm4, %v311_v1, %v327_v11  ;;  %v332_v19 = vsel %vm320_vm4, %v314_v3, %v331_v15  ;;  %v325_v23 = vsel %vm319_vm3, %v322_v5, %v324_v10  ;;  %v99_v26 = vshrl.u32 %v1933_v50, %v93_v2 }
  0x95   :  { %v329_v24 = vsel %vm319_vm3, %v326_v7, %v328_v18  ;;  %v333_v25 = vsel %vm319_vm3, %v330_v8, %v332_v19  ;;  %v97_v31 = vor.u32 %v96_v21, %v95_v17  ;;  %v101_v33 = vshll.u32 %v1933_v50, %v92_v46 }
  0x96   :  { %v2036_v27 = vmul.u32.u64.low %v2005_v39, %v333_v25  ;;  %v2037_v28 = vmul.u32.u64.high %v2005_v39, %v333_v25, %v2036_v27  ;;  %v2040_v29 = vmul.u32.u64.low %v2005_v39, %v329_v24  ;;  %v2041_v30 = vmul.u32.u64.high %v2005_v39, %v329_v24, %v2040_v29 }
  0x97   :  { %v100_v32 = vor.u32 %v99_v26, %v98_v22  ;;  %v102_v34 = vshrl.u32 %v1934_v52, %v93_v2  ;;  %v94_v35 = vshrl.u32 %v1931_v44, %v93_v2  ;;  %v104_v36 = vshll.u32 %v1934_v52, %v92_v46 }
  0x98   :  { %v105_v37 = vshrl.u32 %v1935_v54, %v93_v2  ;;  %v108_v43 = vshrl.u32 %v1936_v61, %v93_v2  ;;  %v341_v45 = vmul.u32 %v2005_v39, %v325_v23  ;;  %v107_v51 = vshll.u32 %v1935_v54, %v92_v46 }
  0x99   :  { %v103_v49 = vor.u32 %v102_v34, %v101_v33  ;;  %vm110_vm6 = vcmp.lt.s32.totalorder %v2007_v40, 1  ;;  %vm343_vm7 = vc.u32 %v2037_v28, %v2040_v29  ;;  %v344_v53 = vadd.s32 1, %v2041_v30 }
  0x9a   :  { %v106_v55 = vor.u32 %v105_v37, %v104_v36  ;;  %vm111_vm8 = vcmp.lt.s32.totalorder %v2007_v40, 2  ;;  %v109_v56 = vor.u32 %v108_v43, %v107_v51  ;;  %vm112_vm9 = vcmp.lt.s32.totalorder %v2007_v40, 3 }
  0x9b   :  { %vm113_vm10 = vcmp.lt.s32.totalorder %v2007_v40, 4  ;;  %v118_v57 = vsel %vm110_vm6, %v97_v31, %v100_v32  ;;  %v345_v39 = vsel %vm343_vm7, %v344_v53, %v2041_v30  ;;  %v122_v59 = vsel %vm110_vm6, %v100_v32, %v103_v49 }
  0x9c   :  { %v115_v58 = vsel %vm113_vm10, %v103_v49, 2102212464  ;;  %v119_v46 = vsel %vm113_vm10, %v106_v55, 920167782  ;;  %v346_v60 = vadd.s32 %v345_v39, %v341_v45  ;;  %v114_v62 = vsel %vm110_vm6, %v94_v35, %v97_v31 }
  0x9d   :  { %v120_v63 = vsel %vm112_vm9, %v103_v49, %v119_v46  ;;  %v123_v0 = vsel %vm113_vm10, %v109_v56, 1326507024  ;;  %v116_v1 = vsel %vm112_vm9, %v100_v32, %v115_v58  ;;  %vm401_vm11 = vcmp.gt.s32.totalorder %v2013_v47, 0 }
  0x9e   :  { %v121_v2 = vsel %vm111_vm8, %v118_v57, %v120_v63  ;;  %v124_v3 = vsel %vm112_vm9, %v106_v55, %v123_v0  ;;  %v347_v4 = vadd.s32 536870912, %v346_v60  ;;  %v117_v15 = vsel %vm111_vm8, %v114_v62, %v116_v1 }
  0x9f   :  { %v125_v5 = vsel %vm111_vm8, %v122_v59, %v124_v3  ;;  %v2066_v6 = vmul.u32.u64.low %v2009_v41, %v121_v2  ;;  %v2067_v7 = vmul.u32.u64.high %v2009_v41, %v121_v2, %v2066_v6  ;;  %v397_v17 = vand.u32 8388607, %v390_v42 }
  0xa0   :  { %v2070_v8 = vmul.u32.u64.low %v2009_v41, %v125_v5  ;;  %v2071_v10 = vmul.u32.u64.high %v2009_v41, %v125_v5, %v2070_v8  ;;  %v348_v11 = vshrl.u32 %v347_v4, 30  ;;  %v402_v18 = vsel %vm401_vm11, %v2013_v47, 0 }
  0xa1   :  { %v136_v21 = vadd.s32 1, %v2067_v7  ;;  %v185_v22 = vand.u32 2139095040, %v2003_v38  ;;  %v133_v23 = vmul.u32 %v2009_v41, %v117_v15  ;;  %v75_v24 = vlaneseq }
  0xa2   :  { %v349_v19 = vshll.u32 %v348_v11, 30  ;;  %vm135_vm12 = vc.u32 %v2071_v10, %v2066_v6  ;;  %v404_v40 = vand.u32 31, %v402_v18  ;;  %v398_v30 = vor.u32 8388608, %v397_v17 }
  0xa3   :  { %v137_v26 = vsel %vm135_vm12, %v136_v21, %v2067_v7  ;;  %v186_v32 = vshrl.u32 %v185_v22, 23  ;;  %v372_v33 = vsub.s32 4, %v348_v11  ;;  %v182_v34 = vand.u32 2147483647, %v2003_v38 }
  0xa4   :  { %v350_v25 = vsub.s32 %v346_v60, %v349_v19  ;;  %v138_v27 = vadd.s32 %v137_v26, %v133_v23  ;;  %v2084_v35 = vand.u32 127, %v75_v24  ;;  %v405_v37 = vsub.s32 32, %v404_v40 }
  0xa5   :  { %v2095_v45 = vshll.u32 %v398_v30, 8  ;;  %v342_v49 = vadd.s32 %v2040_v29, %v2037_v28  ;;  %v2099_v53 = vshrl.u32 %v402_v18, 5  ;;  %v2101_v55 = vadd.s32 4294967169, %v186_v32 }
  0xa6   :  { %v352_v31 = vsub.s32 0, %v350_v25  ;;  %v139_v47 = vadd.s32 536870912, %v138_v27  ;;  %v373_v14 = vsel %vm288_vm14, %v372_v33, %v348_v11  ;;  %v2106_v56 = vadd.s32 %v2066_v6, %v2071_v10 }
  0xa7   :  { %v2111_v39 = vand.u32 8388607, %v182_v34  ;;  %v407_v28 = vshll.u32 %v1931_v44, %v404_v40  ;;  %v408_v29 = vshrl.u32 %v1932_v48, %v405_v37  ;;  %v410_v46 = vshll.u32 %v1932_v48, %v404_v40 }
  0xa8   :  { %v1776_v36 = vmin.u32 %v352_v31, %v350_v25  ;;  %v2093_v43 = vshrl.u32 %v139_v47, 30  ;;  %v411_v60 = vshrl.u32 %v1933_v50, %v405_v37  ;;  %v414_v62 = vshrl.u32 %v1934_v52, %v405_v37 }
  0xa9   :  { %v417_v63 = vshrl.u32 %v1935_v54, %v405_v37  ;;  %v2123_v0 = vsel %vm2088_vm13, 0, %v373_v14  ;;  %v406_v1 = vshrl.u32 %v1931_v44, %v405_v37  ;;  %v420_v2 = vshrl.u32 %v1936_v61, %v405_v37 }
  0xaa   :  { %v354_v51 = vclz %v1776_v36  ;;  %v141_v57 = vshll.u32 %v2093_v43, 30  ;;  %v413_v5 = vshll.u32 %v1933_v50, %v404_v40  ;;  %v416_v6 = vshll.u32 %v1934_v52, %v404_v40 }
  0xab   :  { %v409_v10 = vor.u32 %v408_v29, %v407_v28  ;;  %v419_v11 = vshll.u32 %v1935_v54, %v404_v40  ;;  %v412_v17 = vor.u32 %v411_v60, %v410_v46  ;;  %vm422_vm1 = vcmp.lt.s32.totalorder %v2099_v53, 1 }
  0xac   :  { %v1777_v58 = vadd.s32 4294967294, %v354_v51  ;;  %v2116_v59 = vsub.s32 %v138_v27, %v141_v57  ;;  %v415_v18 = vor.u32 %v414_v62, %v413_v5  ;;  %v418_v19 = vor.u32 %v417_v63, %v416_v6 }
  0xad   :  { %v421_v24 = vor.u32 %v420_v2, %v419_v11  ;;  %v164_v27 = vsub.s32 4, %v2093_v43  ;;  %vm423_vm2 = vcmp.lt.s32.totalorder %v2099_v53, 2  ;;  %vm424_vm3 = vcmp.lt.s32.totalorder %v2099_v53, 3  ;;  %v49_v11 = vpop.permute.xlu1 %48 }
  0xae   :  { %vm1778_vm15 = vcmp.lt.s32.totalorder %v1777_v58, 0  ;;  %v144_v4 = vsub.s32 0, %v2116_v59  ;;  %vm425_vm4 = vcmp.lt.s32.totalorder %v2099_v53, 4  ;;  %v434_v33 = vsel %vm422_vm1, %v412_v17, %v415_v18 }
  0xaf   :  { %v357_v3 = vsel %vm1778_vm15, 0, %v1777_v58  ;;  %v431_v32 = vsel %vm425_vm4, %v418_v19, 920167782  ;;  %vm2144_vm5 = vcmp.le.f32.partialorder %v78_v16, 0.7853982  ;;  %v426_v57 = vsel %vm422_vm1, %v406_v1, %v409_v10 }
  0xb0   :  { %v358_v7 = vsub.s32 32, %v357_v3  ;;  %v362_v8 = vsub.s32 4294967266, %v357_v3  ;;  %v1768_v15 = vmin.u32 %v144_v4, %v2116_v59  ;;  %v359_v21 = vshll.u32 %v350_v25, %v357_v3 }
  0xb1   :  { %v430_v25 = vsel %vm422_vm1, %v409_v10, %v412_v17  ;;  %v427_v37 = vsel %vm425_vm4, %v415_v18, 2102212464  ;;  %v435_v51 = vsel %vm425_vm4, %v421_v24, 1326507024  ;;  %v192_v2 = vadd.s32 1, %v2101_v55 }
  0xb2   :  { %v360_v22 = vshrl.u32 %v342_v49, %v358_v7  ;;  %v363_v23 = vadd.s32 127, %v362_v8  ;;  %v146_v26 = vclz %v1768_v15  ;;  %v432_v49 = vsel %vm424_vm3, %v415_v18, %v431_v32 }
  0xb3   :  { %v436_v58 = vsel %vm424_vm3, %v418_v19, %v435_v51  ;;  %v433_v16 = vsel %vm423_vm2, %v430_v25, %v432_v49  ;;  %v428_v63 = vsel %vm424_vm3, %v412_v17, %v427_v37  ;;  %v379_v17 = vadd.s32 3, %v2123_v0 }
  0xb4   :  { %v361_v30 = vor.u32 %v360_v22, %v359_v21  ;;  %v364_v40 = vshll.u32 %v363_v23, 23  ;;  %v1769_v31 = vadd.s32 4294967294, %v146_v26  ;;  %v437_v46 = vsel %vm423_vm2, %v434_v33, %v436_v58 }
  0xb5   :  { %v2163_v4 = vmul.u32.u64.low %v2095_v45, %v437_v46  ;;  %v2164_v5 = vmul.u32.u64.high %v2095_v45, %v437_v46, %v2163_v4  ;;  %v2168_v8 = vmul.u32.u64.low %v2095_v45, %v433_v16  ;;  %v2169_v10 = vmul.u32.u64.high %v2095_v45, %v433_v16, %v2168_v8 }
  0xb6   :  { %v365_v47 = vor.u32 4788187, %v364_v40  ;;  %v368_v14 = vcvt.s32.f32 %v361_v30  ;;  %vm1770_vm6 = vcmp.lt.s32.totalorder %v1769_v31, 0  ;;  %v165_v55 = vsel %vm80_vm0, %v164_v27, %v2093_v43 }
  0xb7   :  { %v149_v29 = vsel %vm1770_vm6, 0, %v1769_v31  ;;  %vm193_vm7 = vcmp.gt.s32.totalorder %v192_v2, 0  ;;  %v2181_v22 = vand.u32 3, %v2123_v0  ;;  %vm447_vm8 = vc.u32 %v2164_v5, %v2168_v8 }
  0xb8   :  { %v366_v28 = vand.u32 2147483647, %v365_v47  ;;  %v150_v60 = vsub.s32 32, %v149_v29  ;;  %v154_v62 = vsub.s32 4294967266, %v149_v29  ;;  %v151_v1 = vshll.u32 %v2116_v59, %v149_v29 }
  0xb9   :  { %v194_v19 = vsel %vm193_vm7, %v192_v2, 0  ;;  %v2186_v23 = vmul.f32 %v1982_v9, %v49_v11  ;;  %v167_v53 = vsel %vm2144_vm5, 0, %v165_v55  ;;  %v448_v26 = vadd.s32 1, %v2169_v10 }
  0xba   :  { %v369_v3 = vmul.f32 %v368_v14, %v366_v28  ;;  %v152_v6 = vshrl.u32 %v2106_v56, %v150_v60  ;;  %v155_v7 = vadd.s32 127, %v154_v62  ;;  %v429_v56 = vsel %vm423_vm2, %v426_v57, %v428_v63 }
  0xbb   :  { %v2194_v27 = vand.u32 3, %v379_v17  ;;  %v445_v0 = vmul.u32 %v2095_v45, %v429_v56  ;;  %v196_v30 = vand.u32 31, %v194_v19  ;;  %v449_v25 = vsel %vm447_vm8, %v448_v26, %v2169_v10 }
  0xbc   :  { %v370_v15 = vxor.u32 2147483648, %v369_v3  ;;  %v153_v59 = vor.u32 %v152_v6, %v151_v1  ;;  %v156_v18 = vshll.u32 %v155_v7, 23  ;;  %v171_v32 = vadd.s32 3, %v167_v53 }
  0xbd   :  { %v450_v41 = vadd.s32 %v449_v25, %v445_v0  ;;  %v2198_v33 = vshrl.u32 %v194_v19, 5  ;;  %v197_v47 = vsub.s32 32, %v196_v30  ;;  %v199_v49 = vshll.u32 %v1931_v44, %v196_v30 }
  0xbe   :  { %v371_v21 = vsel %vm288_vm14, %v370_v15, %v369_v3  ;;  %v157_v24 = vor.u32 4788187, %v156_v18  ;;  %v160_v31 = vcvt.s32.f32 %v153_v59  ;;  %v202_v51 = vshll.u32 %v1932_v48, %v196_v30 }
  0xbf   :  { %v374_v43 = vsel %vm2088_vm13, %v1985_v12, %v371_v21  ;;  %v205_v14 = vshll.u32 %v1933_v50, %v196_v30  ;;  %v451_v57 = vadd.s32 536870912, %v450_v41  ;;  %v200_v45 = vshrl.u32 %v1932_v48, %v197_v47 }
  0xc0   :  { %1875 = vcosq.f32 %v374_v43  ;;  %v158_v40 = vand.u32 2147483647, %v157_v24  ;;  %v203_v58 = vshrl.u32 %v1933_v50, %v197_v47  ;;  %v208_v28 = vshll.u32 %v1934_v52, %v196_v30 }
  0xc1   :  { %1877 = vsinq.f32 %v374_v43  ;;  %v206_v16 = vshrl.u32 %v1934_v52, %v197_v47  ;;  %v209_v46 = vshrl.u32 %v1935_v54, %v197_v47  ;;  %v212_v60 = vshrl.u32 %v1936_v61, %v197_v47 }
  0xc2   :  { %v161_v37 = vmul.f32 %v160_v31, %v158_v40  ;;  %v2209_v62 = vshrl.u32 %v451_v57, 30  ;;  %v190_v63 = vor.u32 8388608, %v2111_v39  ;;  %v201_v2 = vor.u32 %v200_v45, %v199_v49 }
  0xc3   :  { %v204_v3 = vor.u32 %v203_v58, %v202_v51  ;;  %vm1214_vm9 = vcmp.eq.s32.totalorder %v2181_v22, 2  ;;  %v207_v4 = vor.u32 %v206_v16, %v205_v14  ;;  %v210_v6 = vor.u32 %v209_v46, %v208_v28 }
  0xc4   :  { %v162_v29 = vxor.u32 2147483648, %v161_v37  ;;  %v211_v7 = vshll.u32 %v1935_v54, %v196_v30  ;;  %vm1211_vm10 = vcmp.eq.s32.totalorder %v2181_v22, 0  ;;  %v453_v11 = vshll.u32 %v2209_v62, 30 }
  0xc5   :  { %vm214_vm11 = vcmp.lt.s32.totalorder %v2198_v33, 1  ;;  %vm217_vm12 = vcmp.lt.s32.totalorder %v2198_v33, 4  ;;  %vm77_vm13 = vcmp.lt.s32.totalorder %v2084_v35, 64  ;;  %vm381_vm14 = vcmp.lt.s32.totalorder %v2194_v27, 2 }
  0xc6   :  { %v163_v1 = vsel %vm80_vm0, %v162_v29, %v161_v37  ;;  %vm1210_vm15 = vcmp.lt.s32.totalorder %v2181_v22, 2  ;;  %v213_v39 = vor.u32 %v212_v60, %v211_v7  ;;  %v222_v15 = vsel %vm214_vm11, %v201_v2, %v204_v3 }
  0xc7   :  { %v166_v10 = vsel %vm2144_vm5, %v1988_v13, %v163_v1  ;;  %v223_v36 = vsel %vm217_vm12, %v210_v6, 920167782  ;;  %vm378_vm0 = vweird.f32 %v1985_v12  ;;  %vm382_vm1 = vcmp.eq.s32.totalorder %v2194_v27, 0 }
  0xc8   :  { %1879 = vcosq.f32 %v166_v10  ;;  %v2232_v17 = vsub.s32 %v450_v41, %v453_v11  ;;  %vm216_vm2 = vcmp.lt.s32.totalorder %v2198_v33, 3  ;;  %vm215_vm3 = vcmp.lt.s32.totalorder %v2198_v33, 2 }
  0xc9   :  { %1881 = vsinq.f32 %v166_v10  ;;  %v219_v55 = vsel %vm217_vm12, %v207_v4, 2102212464  ;;  %v224_v59 = vsel %vm216_vm2, %v207_v4, %v223_v36  ;;  %v2240_v18 = vshll.u32 %v190_v63, 8 }
  0xca   :  { %v2242_v56 = vand.u32 3, %v167_v53  ;;  %v456_v19 = vsub.s32 0, %v2232_v17  ;;  %v198_v21 = vshrl.u32 %v1931_v44, %v197_v47  ;;  %v225_v43 = vsel %vm215_vm3, %v222_v15, %v224_v59 }
  0xcb   :  { %v2248_v26 = vand.u32 3, %v171_v32  ;;  %v227_v0 = vsel %vm217_vm12, %v213_v39, 1326507024  ;;  %v2253_v30 = vmul.u32.u64.low %v2240_v18, %v225_v43  ;;  %v2254_v40 = vmul.u32.u64.high %v2240_v18, %v225_v43, %v2253_v30 }
  0xcc   :  { %v1780_v25 = vmin.u32 %v456_v19, %v2232_v17  ;;  %v218_v41 = vsel %vm214_vm11, %v198_v21, %v201_v2  ;;  %v220_v47 = vsel %vm216_vm2, %v204_v3, %v219_v55  ;;  %vm385_vm4 = vcmp.eq.s32.totalorder %v2194_v27, 2 }
  0xcd   :  { %v1876_v24 = vpop.eup %1875  ;;  %v226_v37 = vsel %vm214_vm11, %v204_v3, %v207_v4  ;;  %v228_v49 = vsel %vm216_vm2, %v210_v6, %v227_v0  ;;  %vm1008_vm5 = vcmp.eq.s32.totalorder %v2242_v56, 2  ;;  %vm392_vm6 = vcmp.lt.s32.totalorder %v1995_v20, 0 }
  0xce   :  { %v1878_v53 = vpop.eup %1877  ;;  %v386_v31 = vxor.u32 2147483648, %v1876_v24  ;;  %v458_v57 = vclz %v1780_v25  ;;  %vm174_vm7 = vcmp.eq.s32.totalorder %v2248_v26, 0  ;;  %vm1005_vm8 = vcmp.eq.s32.totalorder %v2242_v56, 0 }
  0xcf   :  { %v383_v32 = vxor.u32 2147483648, %v1878_v53  ;;  %v221_v28 = vsel %vm215_vm3, %v218_v41, %v220_v47  ;;  %v601_v29 = vand.u32 2139095040, %v2186_v23  ;;  %vm1004_vm11 = vcmp.lt.s32.totalorder %v2242_v56, 2 }
  0xd0   :  { %v387_v51 = vsel %vm385_vm4, %v386_v31, %v1878_v53  ;;  %v1216_v14 = vsel %vm1214_vm9, %v386_v31, %v1878_v53  ;;  %vm173_vm9 = vcmp.lt.s32.totalorder %v2248_v26, 2  ;;  %v1781_v60 = vadd.s32 4294967294, %v458_v57 }
  0xd1   :  { %v384_v45 = vsel %vm382_vm1, %v1876_v24, %v383_v32  ;;  %v1213_v58 = vsel %vm1211_vm10, %v1876_v24, %v383_v32  ;;  %v229_v63 = vsel %vm215_vm3, %v226_v37, %v228_v49  ;;  %vm170_vm10 = vweird.f32 %v1988_v13 }
  0xd2   :  { %v388_v16 = vsel %vm381_vm14, %v384_v45, %v387_v51  ;;  %v1217_v46 = vsel %vm1210_vm15, %v1213_v58, %v1216_v14  ;;  %vm2295_vm12 = vcmp.le.f32.partialorder %v390_v42, 0.7853982  ;;  %vm177_vm14 = vcmp.eq.s32.totalorder %v2248_v26, 2 }
  0xd3   :  { %v389_v2 = vsel %vm378_vm0, nan, %v388_v16  ;;  %v1218_v3 = vsel %vm378_vm0, nan, %v1217_v46  ;;  %v2300_v27 = vmul.u32.u64.low %v2240_v18, %v229_v63  ;;  %v2301_v1 = vmul.u32.u64.high %v2240_v18, %v229_v63, %v2300_v27 }
  0xd4   :  { %v1736_v33 = vsel %vm77_vm13, %v389_v2, %v1218_v3  ;;  %vm1782_vm15 = vcmp.lt.s32.totalorder %v1781_v60, 0  ;;  %v240_v12 = vadd.s32 1, %v2254_v40  ;;  %v476_v6 = vsub.s32 4, %v2209_v62 }
  0xd5   :  { %1744 = vst [vmem:[#allocation2 + $0x10] sm:$0xff] %v1736_v33  ;;  %v461_v4 = vsel %vm1782_vm15, 0, %v1781_v60  ;;  %v598_v42 = vand.u32 2147483647, %v2186_v23  ;;  %v602_v7 = vshrl.u32 %v601_v29, 23  ;;  %v1880_v10 = vpop.eup %1879  ;;  %v446_v11 = vadd.s32 %v2168_v8, %v2164_v5  ;;  %v44_v60 = vpop.permute.xlu0 %43 }
  0xd6   :  { %v462_v39 = vsub.s32 32, %v461_v4  ;;  %v466_v15 = vsub.s32 4294967266, %v461_v4  ;;  %v237_v36 = vmul.u32 %v2240_v18, %v221_v28  ;;  %v1882_v55 = vpop.eup %1881  ;;  %v178_v59 = vxor.u32 2147483648, %v1880_v10 }
  0xd7   :  { %v463_v19 = vshll.u32 %v2232_v17, %v461_v4  ;;  %vm239_vm0 = vc.u32 %v2301_v1, %v2253_v30  ;;  %v1787_v21 = vadd.s32 4294967169, %v602_v7  ;;  %v175_v43 = vxor.u32 2147483648, %v1882_v55 }
  0xd8   :  { %v464_v24 = vshrl.u32 %v446_v11, %v462_v39  ;;  %v467_v0 = vadd.s32 127, %v466_v15  ;;  %v241_v53 = vsel %vm239_vm0, %v240_v12, %v2254_v40  ;;  %v179_v5 = vsel %vm177_vm14, %v178_v59, %v1882_v55 }
  0xd9   :  { %v1010_v8 = vsel %vm1008_vm5, %v178_v59, %v1882_v55  ;;  %v477_v18 = vsel %vm392_vm6, %v476_v6, %v2209_v62  ;;  %v242_v17 = vadd.s32 %v241_v53, %v237_v36  ;;  %v176_v31 = vsel %vm174_vm7, %v1880_v10, %v175_v43 }
  0xda   :  { %v1007_v25 = vsel %vm1005_vm8, %v1880_v10, %v175_v43  ;;  %v465_v41 = vor.u32 %v464_v24, %v463_v19  ;;  %v468_v47 = vshll.u32 %v467_v0, 23  ;;  %v180_v40 = vsel %vm173_vm9, %v176_v31, %v179_v5 }
  0xdb   :  { %v1011_v32 = vsel %vm1004_vm11, %v1007_v25, %v1010_v8  ;;  %v243_v37 = vadd.s32 536870912, %v242_v17  ;;  %v608_v49 = vadd.s32 1, %v1787_v21  ;;  %v181_v62 = vsel %vm170_vm10, nan, %v180_v40 }
  0xdc   :  { %v1012_v51 = vsel %vm170_vm10, nan, %v1011_v32  ;;  %v469_v14 = vor.u32 4788187, %v468_v47  ;;  %v479_v57 = vsel %vm2295_vm12, 0, %v477_v18  ;;  %v472_v58 = vcvt.s32.f32 %v465_v41 }
  0xdd   :  { %v1734_v45 = vsel %vm77_vm13, %v181_v62, %v1012_v51  ;;  %v2339_v26 = vshrl.u32 %v243_v37, 30  ;;  %vm609_vm1 = vcmp.gt.s32.totalorder %v608_v49, 0  ;;  %v483_v29 = vadd.s32 3, %v479_v57 }
  0xde   :  { %1742 = vst [vmem:[#allocation2] sm:$0xff] %v1734_v45  ;;  %v470_v56 = vand.u32 2147483647, %v469_v14  ;;  %v610_v28 = vsel %vm609_vm1, %v608_v49, 0  ;;  %v605_v13 = vand.u32 8388607, %v598_v42  ;;  %v2347_v33 = vmul.f32 %v1982_v9, %v44_v60 }
  0xdf   :  { %v245_v16 = vshll.u32 %v2339_v26, 30  ;;  %v612_v46 = vand.u32 31, %v610_v28  ;;  %v2349_v12 = vand.u32 3, %v483_v29  ;;  %v2351_v4 = vand.u32 3, %v479_v57 }
  0xe0   :  { %v473_v63 = vmul.f32 %v472_v58, %v470_v56  ;;  %v606_v7 = vor.u32 8388608, %v605_v13  ;;  %v238_v36 = vadd.s32 %v2253_v30, %v2301_v1  ;;  %v2365_v59 = vshrl.u32 %v610_v28, 5 }
  0xe1   :  { %v2344_v2 = vsub.s32 %v242_v17, %v245_v16  ;;  %v613_v3 = vsub.s32 32, %v612_v46  ;;  %v615_v19 = vshll.u32 %v1931_v44, %v612_v46  ;;  %v618_v21 = vshll.u32 %v1932_v48, %v612_v46 }
  0xe2   :  { %v474_v27 = vxor.u32 2147483648, %v473_v63  ;;  %v621_v43 = vshll.u32 %v1933_v50, %v612_v46  ;;  %v268_v0 = vsub.s32 4, %v2339_v26  ;;  %v2371_v22 = vshll.u32 %v606_v7, 8 }
  0xe3   :  { %v248_v6 = vsub.s32 0, %v2344_v2  ;;  %v616_v11 = vshrl.u32 %v1932_v48, %v613_v3  ;;  %v619_v39 = vshrl.u32 %v1933_v50, %v613_v3  ;;  %v622_v15 = vshrl.u32 %v1934_v52, %v613_v3 }
  0xe4   :  { %v475_v10 = vsel %vm392_vm6, %v474_v27, %v473_v63  ;;  %v624_v1 = vshll.u32 %v1934_v52, %v612_v46  ;;  %v625_v18 = vshrl.u32 %v1935_v54, %v613_v3  ;;  %v627_v17 = vshll.u32 %v1935_v54, %v612_v46 }
  0xe5   :  { %v478_v9 = vsel %vm2295_vm12, %v1995_v20, %v475_v10  ;;  %v1772_v55 = vmin.u32 %v248_v6, %v2344_v2  ;;  %v617_v53 = vor.u32 %v616_v11, %v615_v19  ;;  %v620_v5 = vor.u32 %v619_v39, %v618_v21 }
  0xe6   :  { %1883 = vcosq.f32 %v478_v9  ;;  %v623_v30 = vor.u32 %v622_v15, %v621_v43  ;;  %v628_v31 = vshrl.u32 %v1936_v61, %v613_v3  ;;  %v614_v25 = vshrl.u32 %v1931_v44, %v613_v3 }
  0xe7   :  { %1885 = vsinq.f32 %v478_v9  ;;  %v250_v24 = vclz %v1772_v55  ;;  %vm630_vm2 = vcmp.lt.s32.totalorder %v2365_v59, 1  ;;  %vm631_vm3 = vcmp.lt.s32.totalorder %v2365_v59, 2 }
  0xe8   :  { %v497_v41 = vand.u32 2139095040, %v2347_v33  ;;  %vm184_vm4 = vcmp.lt.s32.totalorder %v2003_v38, 0  ;;  %v626_v47 = vor.u32 %v625_v18, %v624_v1  ;;  %v629_v40 = vor.u32 %v628_v31, %v627_v17 }
  0xe9   :  { %v1773_v8 = vadd.s32 4294967294, %v250_v24  ;;  %vm633_vm6 = vcmp.lt.s32.totalorder %v2365_v59, 4  ;;  %vm632_vm7 = vcmp.lt.s32.totalorder %v2365_v59, 3  ;;  %v634_v37 = vsel %vm630_vm2, %v614_v25, %v617_v53 }
  0xea   :  { %v635_v49 = vsel %vm633_vm6, %v623_v30, 2102212464  ;;  %vm1317_vm8 = vcmp.eq.s32.totalorder %v2351_v4, 2  ;;  %v638_v14 = vsel %vm630_vm2, %v617_v53, %v620_v5  ;;  %v642_v57 = vsel %vm630_vm2, %v620_v5, %v623_v30 }
  0xeb   :  { %vm1774_vm5 = vcmp.lt.s32.totalorder %v1773_v8, 0  ;;  %vm1314_vm9 = vcmp.eq.s32.totalorder %v2351_v4, 0  ;;  %v639_v56 = vsel %vm633_vm6, %v626_v47, 920167782  ;;  %v643_v58 = vsel %vm633_vm6, %v629_v40, 1326507024 }
  0xec   :  { %v253_v32 = vsel %vm1774_vm5, 0, %v1773_v8  ;;  %v498_v28 = vshrl.u32 %v497_v41, 23  ;;  %vm1313_vm11 = vcmp.lt.s32.totalorder %v2351_v4, 2  ;;  %v640_v13 = vsel %vm632_vm7, %v623_v30, %v639_v56 }
  0xed   :  { %v254_v62 = vsub.s32 32, %v253_v32  ;;  %v258_v51 = vsub.s32 4294967266, %v253_v32  ;;  %v255_v45 = vshll.u32 %v2344_v2, %v253_v32  ;;  %v644_v46 = vsel %vm632_vm7, %v626_v47, %v643_v58 }
  0xee   :  { %vm482_vm10 = vweird.f32 %v1995_v20  ;;  %v636_v60 = vsel %vm632_vm7, %v620_v5, %v635_v49  ;;  %v641_v63 = vsel %vm631_vm3, %v638_v14, %v640_v13  ;;  %v645_v2 = vsel %vm631_vm3, %v642_v57, %v644_v46 }
  0xef   :  { %v256_v29 = vshrl.u32 %v238_v36, %v254_v62  ;;  %v259_v16 = vadd.s32 127, %v258_v51  ;;  %v1783_v3 = vadd.s32 4294967169, %v498_v28  ;;  %vm485_vm12 = vcmp.lt.s32.totalorder %v2349_v12, 2 }
  0xf0   :  { %v2406_v7 = vmul.u32.u64.low %v2371_v22, %v645_v2  ;;  %v2407_v10 = vmul.u32.u64.high %v2371_v22, %v645_v2, %v2406_v7  ;;  %v2411_v11 = vmul.u32.u64.low %v2371_v22, %v641_v63  ;;  %v2412_v39 = vmul.u32.u64.high %v2371_v22, %v641_v63, %v2411_v11 }
  0xf1   :  { %v257_v27 = vor.u32 %v256_v29, %v255_v45  ;;  %v260_v6 = vshll.u32 %v259_v16, 23  ;;  %v504_v15 = vadd.s32 1, %v1783_v3  ;;  %vm486_vm14 = vcmp.eq.s32.totalorder %v2349_v12, 0  ;;  %v59_v7 = vpop.permute.xlu1 %58 }
  0xf2   :  { %vm489_vm15 = vcmp.eq.s32.totalorder %v2349_v12, 2  ;;  %v494_v55 = vand.u32 2147483647, %v2347_v33  ;;  %v269_v43 = vsel %vm184_vm4, %v268_v0, %v2339_v26  ;;  %v637_v24 = vsel %vm631_vm3, %v634_v37, %v636_v60 }
  0xf3   :  { %v1884_v9 = vpop.eup %1883  ;;  %v261_v36 = vor.u32 4788187, %v260_v6  ;;  %vm505_vm0 = vcmp.gt.s32.totalorder %v504_v15, 0  ;;  %v264_v30 = vcvt.s32.f32 %v257_v27  ;;  %vm655_vm1 = vc.u32 %v2407_v10, %v2411_v11 }
  0xf4   :  { %v1886_v19 = vpop.eup %1885  ;;  %v490_v21 = vxor.u32 2147483648, %v1884_v9  ;;  %v656_v18 = vadd.s32 1, %v2412_v39  ;;  %v506_v17 = vsel %vm505_vm0, %v504_v15, 0  ;;  %v653_v31 = vmul.u32 %v2371_v22, %v637_v24 }
  0xf5   :  { %v487_v53 = vxor.u32 2147483648, %v1886_v19  ;;  %v262_v5 = vand.u32 2147483647, %v261_v36  ;;  %v508_v40 = vand.u32 31, %v506_v17  ;;  %vm183_vm2 = vcmp.le.f32.partialorder %v182_v34, 0.7853982 }
  0xf6   :  { %v491_v1 = vsel %vm489_vm15, %v490_v21, %v1886_v19  ;;  %v1319_v8 = vsel %vm1317_vm8, %v490_v21, %v1886_v19  ;;  %v657_v47 = vsel %vm655_vm1, %v656_v18, %v2412_v39  ;;  %v271_v51 = vsel %vm183_vm2, 0, %v269_v43 }
  0xf7   :  { %v488_v26 = vsel %vm486_vm14, %v1884_v9, %v487_v53  ;;  %v1316_v59 = vsel %vm1314_vm9, %v1884_v9, %v487_v53  ;;  %v265_v0 = vmul.f32 %v264_v30, %v262_v5  ;;  %v658_v62 = vadd.s32 %v657_v47, %v653_v31  ;;  %v2473_v5 = vld [vmem:[%s2728_s1] ss:$0 sm:$0xff]  ;;  %s1937_s1 = smov [#allocation2]  }
  0xf8   :  { %v492_v25 = vsel %vm485_vm12, %v488_v26, %v491_v1  ;;  %v1320_v41 = vsel %vm1313_vm11, %v1316_v59, %v1319_v8  ;;  %v509_v12 = vsub.s32 32, %v508_v40  ;;  %v501_v20 = vand.u32 8388607, %v494_v55  ;;  %s1755_s28 = sshll.u32 %s1937_s1, 4  ;;  %s1756_s28 = int_to_ptr.vmem [resolvable:$true] %s1755_s28 }
  0xf9   :  { %v493_v32 = vsel %vm482_vm10, nan, %v492_v25  ;;  %v1321_v37 = vsel %vm482_vm10, nan, %v1320_v41  ;;  %v266_v49 = vxor.u32 2147483648, %v265_v0  ;;  %v659_v14 = vadd.s32 536870912, %v658_v62  ;;  %s1908_s29 = scalar_lea.vmem %s1756_s28, 1024  ;;  %p1913_p1 = scmp.lt.s32.totalorder %s1756_s28, %s1756_s28 }
  0xfa   :  { %v1737_v22 = vsel %vm77_vm13, %v493_v32, %v1321_v37  ;;  %v512_v45 = vshrl.u32 %v1932_v48, %v509_v12  ;;  %v515_v56 = vshrl.u32 %v1933_v50, %v509_v12  ;;  %v518_v34 = vshrl.u32 %v1934_v52, %v509_v12  ;;  %p1909_p0 = scmp.ne.s32.totalorder %s1756_s28, %s1908_s29  ;;  %p1914_p2 = scmp.lt.s32.totalorder %s1908_s29, %s1908_s29 }
  0xfb   :  { %1745 = vst [vmem:[#allocation2 + $0x18] sm:$0xff] %v1737_v22  ;;  %v267_v4 = vsel %vm184_vm4, %v266_v49, %v265_v0  ;;  %v2453_v58 = vshrl.u32 %v659_v14, 30  ;;  %v521_v28 = vshrl.u32 %v1935_v54, %v509_v12  ;;  %v275_v29 = vadd.s32 3, %v271_v51 }
  0xfc   :  { %v270_v57 = vsel %vm183_vm2, %v2003_v38, %v267_v4  ;;  %v2457_v16 = vshrl.u32 %v506_v17, 5  ;;  %v520_v13 = vshll.u32 %v1934_v52, %v508_v40  ;;  %v511_v60 = vshll.u32 %v1931_v44, %v508_v40  ;;  %p1915_p3 = por %p1914_p2, %p1913_p1 }
  0xfd   :  { %1887 = vcosq.f32 %v270_v57  ;;  %v661_v46 = vshll.u32 %v2453_v58, 30  ;;  %v514_v63 = vshll.u32 %v1932_v48, %v508_v40  ;;  %v517_v2 = vshll.u32 %v1933_v50, %v508_v40 }
  0xfe   :  { %1889 = vsinq.f32 %v270_v57  ;;  %v522_v3 = vor.u32 %v521_v28, %v520_v13  ;;  %v523_v27 = vshll.u32 %v1935_v54, %v508_v40  ;;  %v524_v6 = vshrl.u32 %v1936_v61, %v509_v12  ;;  %p1916_p4 = pnand %p1915_p3, %p1909_p0 }
  0xff   :  { %v2466_v39 = vsub.s32 %v658_v62, %v661_v46  ;;  %v513_v15 = vor.u32 %v512_v45, %v511_v60  ;;  %v516_v9 = vor.u32 %v515_v56, %v514_v63  ;;  %v519_v36 = vor.u32 %v518_v34, %v517_v2 }
 0x100   :  { %v276_v19 = vand.u32 3, %v275_v29  ;;  %v1106_v21 = vand.u32 3, %v271_v51  ;;  %v525_v43 = vor.u32 %v524_v6, %v523_v27  ;;  %v502_v53 = vor.u32 8388608, %v501_v20 }
 0x101   :  { %v664_v24 = vsub.s32 0, %v2466_v39  ;;  %vm529_vm3 = vcmp.lt.s32.totalorder %v2457_v16, 4  ;;  %v2476_v30 = vmul.f32 %v2473_v5, %v59_v7  ;;  %vm526_vm4 = vcmp.lt.s32.totalorder %v2457_v16, 1 }
 0x102   :  { %vm528_vm5 = vcmp.lt.s32.totalorder %v2457_v16, 3  ;;  %v535_v1 = vsel %vm529_vm3, %v522_v3, 920167782  ;;  %v539_v8 = vsel %vm529_vm3, %v525_v43, 1326507024  ;;  %v534_v26 = vsel %vm526_vm4, %v513_v15, %v516_v9 }
 0x103   :  { %v1788_v18 = vmin.u32 %v664_v24, %v2466_v39  ;;  %v531_v17 = vsel %vm529_vm3, %v519_v36, 2102212464  ;;  %v538_v59 = vsel %vm526_vm4, %v516_v9, %v519_v36  ;;  %vm1107_vm6 = vcmp.lt.s32.totalorder %v1106_v21, 2 }
 0x104   :  { %vm1108_vm7 = vcmp.eq.s32.totalorder %v1106_v21, 0  ;;  %v510_v0 = vshrl.u32 %v1931_v44, %v509_v12  ;;  %v536_v31 = vsel %vm528_vm5, %v519_v36, %v535_v1  ;;  %v540_v25 = vsel %vm528_vm5, %v522_v3, %v539_v8 }
 0x105   :  { %vm274_vm8 = vweird.f32 %v2003_v38  ;;  %vm1111_vm9 = vcmp.eq.s32.totalorder %v1106_v21, 2  ;;  %v666_v41 = vclz %v1788_v18  ;;  %vm527_vm11 = vcmp.lt.s32.totalorder %v2457_v16, 2  ;;  %v54_v18 = vpop.permute.xlu0 %53 }
 0x106   :  { %v542_v47 = vshll.u32 %v502_v53, 8  ;;  %vm600_vm10 = vcmp.lt.s32.totalorder %v2186_v23, 0  ;;  %v530_v40 = vsel %vm526_vm4, %v510_v0, %v513_v15  ;;  %v532_v32 = vsel %vm528_vm5, %v516_v9, %v531_v17 }
 0x107   :  { %v537_v37 = vsel %vm527_vm11, %v534_v26, %v536_v31  ;;  %v541_v49 = vsel %vm527_vm11, %v538_v59, %v540_v25  ;;  %v1789_v62 = vadd.s32 4294967294, %v666_v41  ;;  %v809_v4 = vand.u32 2139095040, %v2476_v30 }
 0x108   :  { %v2501_v22 = vmul.u32.u64.low %v542_v47, %v541_v49  ;;  %v2502_v12 = vmul.u32.u64.high %v542_v47, %v541_v49, %v2501_v22  ;;  %vm277_vm12 = vcmp.lt.s32.totalorder %v276_v19, 2  ;;  %vm278_vm14 = vcmp.eq.s32.totalorder %v276_v19, 0 }
 0x109   :  { %v2505_v14 = vmul.u32.u64.low %v542_v47, %v537_v37  ;;  %v2506_v57 = vmul.u32.u64.high %v542_v47, %v537_v37, %v2505_v14  ;;  %vm281_vm15 = vcmp.eq.s32.totalorder %v276_v19, 2  ;;  %v654_v56 = vadd.s32 %v2411_v11, %v2407_v10 }
 0x10a   :  { %v1888_v51 = vpop.eup %1887  ;;  %vm1790_vm0 = vcmp.lt.s32.totalorder %v1789_v62, 0  ;;  %v684_v29 = vsub.s32 4, %v2453_v58  ;;  %v533_v13 = vsel %vm527_vm11, %v530_v40, %v532_v32  ;;  %v810_v2 = vshrl.u32 %v809_v4, 23 }
 0x10b   :  { %v1890_v20 = vpop.eup %1889  ;;  %v282_v45 = vxor.u32 2147483648, %v1888_v51  ;;  %v669_v28 = vsel %vm1790_vm0, 0, %v1789_v62  ;;  %vm551_vm1 = vc.u32 %v2502_v12, %v2505_v14  ;;  %v552_v43 = vadd.s32 1, %v2506_v57 }
 0x10c   :  { %v279_v34 = vxor.u32 2147483648, %v1890_v20  ;;  %v670_v63 = vsub.s32 32, %v669_v28  ;;  %v671_v6 = vshll.u32 %v2466_v39, %v669_v28  ;;  %v674_v10 = vsub.s32 4294967266, %v669_v28 }
 0x10d   :  { %v283_v46 = vsel %vm281_vm15, %v282_v45, %v1890_v20  ;;  %v1113_v60 = vsel %vm1111_vm9, %v282_v45, %v1890_v20  ;;  %v685_v19 = vsel %vm600_vm10, %v684_v29, %v2453_v58  ;;  %v549_v21 = vmul.u32 %v542_v47, %v533_v13 }
 0x10e   :  { %v280_v3 = vsel %vm278_vm14, %v1888_v51, %v279_v34  ;;  %v1110_v27 = vsel %vm1108_vm7, %v1888_v51, %v279_v34  ;;  %v672_v15 = vshrl.u32 %v654_v56, %v670_v63  ;;  %v675_v36 = vadd.s32 127, %v674_v10 }
 0x10f   :  { %v284_v11 = vsel %vm277_vm12, %v280_v3, %v283_v46  ;;  %v1114_v7 = vsel %vm1107_vm6, %v1110_v27, %v1113_v60  ;;  %v1795_v24 = vadd.s32 4294967169, %v810_v2  ;;  %v553_v8 = vsel %vm551_vm1, %v552_v43, %v2506_v57 }
 0x110   :  { %v285_v16 = vsel %vm274_vm8, nan, %v284_v11  ;;  %v1115_v9 = vsel %vm274_vm8, nan, %v1114_v7  ;;  %v673_v53 = vor.u32 %v672_v15, %v671_v6  ;;  %v676_v1 = vshll.u32 %v675_v36, 23 }
 0x111   :  { %v1735_v39 = vsel %vm77_vm13, %v285_v16, %v1115_v9  ;;  %vm2535_vm2 = vcmp.le.f32.partialorder %v598_v42, 0.7853982  ;;  %v554_v17 = vadd.s32 %v553_v8, %v549_v21  ;;  %v806_v26 = vand.u32 2147483647, %v2476_v30 }
 0x112   :  { %1743 = vst [vmem:[#allocation2 + $0x8] sm:$0xff] %v1735_v39  ;;  %v816_v59 = vadd.s32 1, %v1795_v24  ;;  %v677_v0 = vor.u32 4788187, %v676_v1  ;;  %v687_v58 = vsel %vm2535_vm2, 0, %v685_v19  ;;  %v2543_v25 = vmul.f32 %v2473_v5, %v54_v18 }
 0x113   :  { %v555_v31 = vadd.s32 536870912, %v554_v17  ;;  %v680_v47 = vcvt.s32.f32 %v673_v53  ;;  %v691_v42 = vadd.s32 3, %v687_v58  ;;  %v813_v37 = vand.u32 8388607, %v806_v26 }
 0x114   :  { %vm817_vm3 = vcmp.gt.s32.totalorder %v816_v59, 0  ;;  %v678_v41 = vand.u32 2147483647, %v677_v0  ;;  %v705_v51 = vand.u32 2139095040, %v2543_v25  ;;  %v2553_v5 = vand.u32 3, %v687_v58 }
 0x115   :  { %v818_v40 = vsel %vm817_vm3, %v816_v59, 0  ;;  %v2545_v32 = vshrl.u32 %v555_v31, 30  ;;  %v2551_v20 = vand.u32 3, %v691_v42  ;;  %v814_v56 = vor.u32 8388608, %v813_v37 }
 0x116   :  { %v820_v49 = vand.u32 31, %v818_v40  ;;  %v681_v62 = vmul.f32 %v680_v47, %v678_v41  ;;  %v702_v63 = vand.u32 2147483647, %v2543_v25  ;;  %v706_v2 = vshrl.u32 %v705_v51, 23 }
 0x117   :  { %v557_v22 = vshll.u32 %v2545_v32, 30  ;;  %v819_v11 = vshrl.u32 %v818_v40, 5  ;;  %v550_v43 = vadd.s32 %v2505_v14, %v2502_v12  ;;  %v2575_v19 = vshll.u32 %v814_v56, 8 }
 0x118   :  { %v821_v4 = vsub.s32 32, %v820_v49  ;;  %v682_v57 = vxor.u32 2147483648, %v681_v62  ;;  %v823_v3 = vshll.u32 %v1931_v44, %v820_v49  ;;  %v826_v27 = vshll.u32 %v1932_v48, %v820_v49 }
 0x119   :  { %v2555_v45 = vsub.s32 %v554_v17, %v557_v22  ;;  %v829_v6 = vshll.u32 %v1933_v50, %v820_v49  ;;  %v832_v7 = vshll.u32 %v1934_v52, %v820_v49  ;;  %v1791_v21 = vadd.s32 4294967169, %v706_v2 }
 0x11a   :  { %v683_v34 = vsel %vm600_vm10, %v682_v57, %v681_v62  ;;  %v824_v28 = vshrl.u32 %v1932_v48, %v821_v4  ;;  %v827_v29 = vshrl.u32 %v1933_v50, %v821_v4  ;;  %v830_v13 = vshrl.u32 %v1934_v52, %v821_v4 }
 0x11b   :  { %v686_v46 = vsel %vm2535_vm2, %v2186_v23, %v683_v34  ;;  %v560_v60 = vsub.s32 0, %v2555_v45  ;;  %v833_v36 = vshrl.u32 %v1935_v54, %v821_v4  ;;  %v822_v24 = vshrl.u32 %v1931_v44, %v821_v4 }
 0x11c   :  { %1891 = vcosq.f32 %v686_v46  ;;  %v825_v15 = vor.u32 %v824_v28, %v823_v3  ;;  %v828_v16 = vor.u32 %v827_v29, %v826_v27  ;;  %v831_v9 = vor.u32 %v830_v13, %v829_v6 }
 0x11d   :  { %1893 = vsinq.f32 %v686_v46  ;;  %v1784_v10 = vmin.u32 %v560_v60, %v2555_v45  ;;  %v834_v53 = vor.u32 %v833_v36, %v832_v7  ;;  %v835_v1 = vshll.u32 %v1935_v54, %v820_v49 }
 0x11e   :  { %v836_v8 = vshrl.u32 %v1936_v61, %v821_v4  ;;  %vm838_vm4 = vcmp.lt.s32.totalorder %v819_v11, 1  ;;  %vm840_vm5 = vcmp.lt.s32.totalorder %v819_v11, 3  ;;  %vm841_vm6 = vcmp.lt.s32.totalorder %v819_v11, 4 }
 0x11f   :  { %v562_v39 = vclz %v1784_v10  ;;  %v843_v17 = vsel %vm841_vm6, %v831_v9, 2102212464  ;;  %v846_v59 = vsel %vm838_vm4, %v825_v15, %v828_v16  ;;  %v847_v0 = vsel %vm841_vm6, %v834_v53, 920167782 }
 0x120   :  { %v837_v38 = vor.u32 %v836_v8, %v835_v1  ;;  %vm1523_vm7 = vcmp.eq.s32.totalorder %v2553_v5, 2  ;;  %vm839_vm9 = vcmp.lt.s32.totalorder %v819_v11, 2  ;;  %v848_v12 = vsel %vm840_vm5, %v831_v9, %v847_v0 }
 0x121   :  { %v1785_v18 = vadd.s32 4294967294, %v562_v39  ;;  %v850_v14 = vsel %vm838_vm4, %v828_v16, %v831_v9  ;;  %vm1520_vm11 = vcmp.eq.s32.totalorder %v2553_v5, 0  ;;  %v842_v31 = vsel %vm838_vm4, %v822_v24, %v825_v15 }
 0x122   :  { %v849_v41 = vsel %vm839_vm9, %v846_v59, %v848_v12  ;;  %v851_v47 = vsel %vm841_vm6, %v837_v38, 1326507024  ;;  %vm1519_vm10 = vcmp.lt.s32.totalorder %v2553_v5, 2  ;;  %vm496_vm12 = vcmp.lt.s32.totalorder %v2347_v33, 0 }
 0x123   :  { %vm1786_vm8 = vcmp.lt.s32.totalorder %v1785_v18, 0  ;;  %v844_v37 = vsel %vm840_vm5, %v828_v16, %v843_v17  ;;  %v852_v49 = vsel %vm840_vm5, %v834_v53, %v851_v47  ;;  %vm690_vm14 = vweird.f32 %v2186_v23 }
 0x124   :  { %v565_v58 = vsel %vm1786_vm8, 0, %v1785_v18  ;;  %v853_v22 = vsel %vm839_vm9, %v850_v14, %v852_v49  ;;  %v2592_v4 = vmul.u32.u64.low %v2575_v19, %v849_v41  ;;  %v2593_v51 = vmul.u32.u64.high %v2575_v19, %v849_v41, %v2592_v4 }
 0x125   :  { %v566_v40 = vsub.s32 32, %v565_v58  ;;  %v570_v42 = vsub.s32 4294967266, %v565_v58  ;;  %v567_v62 = vshll.u32 %v2555_v45, %v565_v58  ;;  %vm693_vm15 = vcmp.lt.s32.totalorder %v2551_v20, 2 }
 0x126   :  { %v2597_v34 = vmul.u32.u64.low %v2575_v19, %v853_v22  ;;  %v2598_v28 = vmul.u32.u64.high %v2575_v19, %v853_v22, %v2597_v34  ;;  %vm694_vm0 = vcmp.eq.s32.totalorder %v2551_v20, 0  ;;  %v845_v29 = vsel %vm839_vm9, %v842_v31, %v844_v37 }
 0x127   :  { %v568_v57 = vshrl.u32 %v550_v43, %v566_v40  ;;  %v571_v56 = vadd.s32 127, %v570_v42  ;;  %v712_v45 = vadd.s32 1, %v1791_v21  ;;  %vm697_vm1 = vcmp.eq.s32.totalorder %v2551_v20, 2 }
 0x128   :  { %v2606_v2 = vand.u32 8388607, %v702_v63  ;;  %v580_v6 = vsub.s32 4, %v2545_v32  ;;  %v864_v10 = vadd.s32 1, %v2593_v51  ;;  %v861_v16 = vmul.u32 %v2575_v19, %v845_v29 }
 0x129   :  { %v1892_v13 = vpop.eup %1891  ;;  %v569_v46 = vor.u32 %v568_v57, %v567_v62  ;;  %v572_v60 = vshll.u32 %v571_v56, 23  ;;  %vm713_vm2 = vcmp.gt.s32.totalorder %v712_v45, 0  ;;  %vm863_vm3 = vc.u32 %v2598_v28, %v2592_v4 }
 0x12a   :  { %v1894_v3 = vpop.eup %1893  ;;  %v698_v27 = vxor.u32 2147483648, %v1892_v13  ;;  %v714_v43 = vsel %vm713_vm2, %v712_v45, 0  ;;  %v865_v53 = vsel %vm863_vm3, %v864_v10, %v2593_v51  ;;  %v581_v8 = vsel %vm496_vm12, %v580_v6, %v2545_v32 }
 0x12b   :  { %v695_v7 = vxor.u32 2147483648, %v1894_v3  ;;  %v573_v11 = vor.u32 4788187, %v572_v60  ;;  %v576_v15 = vcvt.s32.f32 %v569_v46  ;;  %v866_v18 = vadd.s32 %v865_v53, %v861_v16 }
 0x12c   :  { %v699_v9 = vsel %vm697_vm1, %v698_v27, %v1894_v3  ;;  %v1525_v36 = vsel %vm1523_vm7, %v698_v27, %v1894_v3  ;;  %v716_v0 = vand.u32 31, %v714_v43  ;;  %vm495_vm4 = vcmp.le.f32.partialorder %v494_v55, 0.7853982 }
 0x12d   :  { %v696_v39 = vsel %vm694_vm0, %v1892_v13, %v695_v7  ;;  %v1522_v21 = vsel %vm1520_vm11, %v1892_v13, %v695_v7  ;;  %v574_v24 = vand.u32 2147483647, %v573_v11  ;;  %v867_v12 = vadd.s32 536870912, %v866_v18 }
 0x12e   :  { %v700_v19 = vsel %vm693_vm15, %v696_v39, %v699_v9  ;;  %v1526_v1 = vsel %vm1519_vm10, %v1522_v21, %v1525_v36  ;;  %v717_v14 = vsub.s32 32, %v716_v0  ;;  %v583_v32 = vsel %vm495_vm4, 0, %v581_v8 }
 0x12f   :  { %v701_v38 = vsel %vm690_vm14, nan, %v700_v19  ;;  %v1527_v17 = vsel %vm690_vm14, nan, %v1526_v1  ;;  %v577_v59 = vmul.f32 %v576_v15, %v574_v24  ;;  %v2635_v58 = vshrl.u32 %v867_v12, 30 }
 0x130   :  { %v1739_v20 = vsel %vm77_vm13, %v701_v38, %v1527_v17  ;;  %v710_v31 = vor.u32 8388608, %v2606_v2  ;;  %v2640_v41 = vshrl.u32 %v714_v43, 5  ;;  %v720_v47 = vshrl.u32 %v1932_v48, %v717_v14 }
 0x131   :  { %1747 = vst [vmem:[#allocation2 + $0x28] sm:$0xff] %v1739_v20  ;;  %v578_v5 = vxor.u32 2147483648, %v577_v59  ;;  %v723_v40 = vshrl.u32 %v1933_v50, %v717_v14  ;;  %v869_v55 = vshll.u32 %v2635_v58, 30  ;;  %v719_v37 = vshll.u32 %v1931_v44, %v716_v0 }
 0x132   :  { %v726_v49 = vshrl.u32 %v1934_v52, %v717_v14  ;;  %v722_v62 = vshll.u32 %v1932_v48, %v716_v0  ;;  %v728_v22 = vshll.u32 %v1934_v52, %v716_v0  ;;  %v729_v51 = vshrl.u32 %v1935_v54, %v717_v14 }
 0x133   :  { %v579_v23 = vsel %vm496_vm12, %v578_v5, %v577_v59  ;;  %v2651_v57 = vsub.s32 %v866_v18, %v869_v55  ;;  %v725_v56 = vshll.u32 %v1933_v50, %v716_v0  ;;  %v731_v34 = vshll.u32 %v1935_v54, %v716_v0 }
 0x134   :  { %v582_v42 = vsel %vm495_vm4, %v2347_v33, %v579_v23  ;;  %v721_v29 = vor.u32 %v720_v47, %v719_v37  ;;  %v724_v45 = vor.u32 %v723_v40, %v722_v62  ;;  %v730_v13 = vor.u32 %v729_v51, %v728_v22 }
 0x135   :  { %1895 = vcosq.f32 %v582_v42  ;;  %v732_v46 = vshrl.u32 %v1936_v61, %v717_v14  ;;  %v872_v60 = vsub.s32 0, %v2651_v57  ;;  %v727_v2 = vor.u32 %v726_v49, %v725_v56 }
 0x136   :  { %1897 = vsinq.f32 %v582_v42  ;;  %v587_v3 = vadd.s32 3, %v583_v32  ;;  %vm734_vm5 = vcmp.lt.s32.totalorder %v2640_v41, 1  ;;  %vm737_vm6 = vcmp.lt.s32.totalorder %v2640_v41, 4 }
 0x137   :  { %v733_v48 = vor.u32 %v732_v46, %v731_v34  ;;  %v1796_v52 = vmin.u32 %v872_v60, %v2651_v57  ;;  %v1415_v27 = vand.u32 3, %v583_v32  ;;  %v742_v50 = vsel %vm734_vm5, %v721_v29, %v724_v45 }
 0x138   :  { %v743_v54 = vsel %vm737_vm6, %v730_v13, 920167782  ;;  %v750_v6 = vshll.u32 %v710_v31, 8  ;;  %vm735_vm7 = vcmp.lt.s32.totalorder %v2640_v41, 2  ;;  %vm736_vm8 = vcmp.lt.s32.totalorder %v2640_v41, 3 }
 0x139   :  { %v874_v10 = vclz %v1796_v52  ;;  %v746_v61 = vsel %vm734_vm5, %v724_v45, %v727_v2  ;;  %v718_v7 = vshrl.u32 %v1931_v44, %v717_v14  ;;  %v739_v11 = vsel %vm737_vm6, %v727_v2, 2102212464 }
 0x13a   :  { %v744_v15 = vsel %vm736_vm8, %v727_v2, %v743_v54  ;;  %v747_v16 = vsel %vm737_vm6, %v733_v48, 1326507024  ;;  %v588_v9 = vand.u32 3, %v587_v3  ;;  %vm586_vm9 = vweird.f32 %v2347_v33 }
 0x13b   :  { %v1797_v36 = vadd.s32 4294967294, %v874_v10  ;;  %v745_v43 = vsel %vm735_vm7, %v742_v50, %v744_v15  ;;  %v748_v39 = vsel %vm736_vm8, %v730_v13, %v747_v16  ;;  %v738_v21 = vsel %vm734_vm5, %v718_v7, %v721_v29 }
 0x13c   :  { %v749_v24 = vsel %vm735_vm7, %v746_v61, %v748_v39  ;;  %v2674_v53 = vmul.u32.u64.low %v750_v6, %v745_v43  ;;  %v2675_v19 = vmul.u32.u64.high %v750_v6, %v745_v43, %v2674_v53  ;;  %v740_v44 = vsel %vm736_vm8, %v724_v45, %v739_v11 }
 0x13d   :  { %vm1798_vm11 = vcmp.lt.s32.totalorder %v1797_v36, 0  ;;  %v2678_v1 = vmul.u32.u64.low %v750_v6, %v749_v24  ;;  %v2679_v8 = vmul.u32.u64.high %v750_v6, %v749_v24, %v2678_v1  ;;  %vm1416_vm10 = vcmp.lt.s32.totalorder %v1415_v27, 2 }
 0x13e   :  { %vm1417_vm12 = vcmp.eq.s32.totalorder %v1415_v27, 0  ;;  %vm1420_vm14 = vcmp.eq.s32.totalorder %v1415_v27, 2  ;;  %v877_v18 = vsel %vm1798_vm11, 0, %v1797_v36  ;;  %vm589_vm15 = vcmp.lt.s32.totalorder %v588_v9, 2 }
 0x13f   :  { %v862_v17 = vadd.s32 %v2592_v4, %v2598_v28  ;;  %v878_v59 = vsub.s32 32, %v877_v18  ;;  %v882_v0 = vsub.s32 4294967266, %v877_v18  ;;  %vm593_vm0 = vcmp.eq.s32.totalorder %v588_v9, 2 }
 0x140   :  { %v741_v5 = vsel %vm735_vm7, %v738_v21, %v740_v44  ;;  %v760_v14 = vadd.s32 1, %v2675_v19  ;;  %v879_v31 = vshll.u32 %v2651_v57, %v877_v18  ;;  %vm590_vm1 = vcmp.eq.s32.totalorder %v588_v9, 0 }
 0x141   :  { %v880_v23 = vshrl.u32 %v862_v17, %v878_v59  ;;  %v883_v47 = vadd.s32 127, %v882_v0  ;;  %vm759_vm2 = vc.u32 %v2679_v8, %v2674_v53  ;;  %v757_v62 = vmul.u32 %v750_v6, %v741_v5 }
 0x142   :  { %v1896_v38 = vpop.eup %1895  ;;  %v761_v22 = vsel %vm759_vm2, %v760_v14, %v2675_v19  ;;  %vm808_vm3 = vcmp.lt.s32.totalorder %v2476_v30, 0  ;;  %v892_v3 = vsub.s32 4, %v2635_v58  ;;  %vm807_vm4 = vcmp.le.f32.partialorder %v806_v26, 0.7853982 }
 0x143   :  { %v1898_v20 = vpop.eup %1897  ;;  %v594_v12 = vxor.u32 2147483648, %v1896_v38  ;;  %v881_v55 = vor.u32 %v880_v23, %v879_v31  ;;  %v884_v41 = vshll.u32 %v883_v47, 23  ;;  %v762_v29 = vadd.s32 %v761_v22, %v757_v62 }
 0x144   :  { %v591_v32 = vxor.u32 2147483648, %v1898_v20  ;;  %v893_v54 = vsel %vm808_vm3, %v892_v3, %v2635_v58  ;;  %v758_v26 = vadd.s32 %v2674_v53, %v2679_v8 }
 0x145   :  { %v595_v40 = vsel %vm593_vm0, %v594_v12, %v1898_v20  ;;  %v1422_v42 = vsel %vm1420_vm14, %v594_v12, %v1898_v20  ;;  %v885_v56 = vor.u32 4788187, %v884_v41  ;;  %v888_v13 = vcvt.s32.f32 %v881_v55 }
 0x146   :  { %v592_v4 = vsel %vm590_vm1, %v1896_v38, %v591_v32  ;;  %v1419_v28 = vsel %vm1417_vm12, %v1896_v38, %v591_v32  ;;  %v763_v46 = vadd.s32 536870912, %v762_v29  ;;  %v895_v61 = vsel %vm807_vm4, 0, %v893_v54 }
 0x147   :  { %v596_v37 = vsel %vm589_vm15, %v592_v4, %v595_v40  ;;  %v1423_v49 = vsel %vm1416_vm10, %v1419_v28, %v1422_v42  ;;  %v886_v45 = vand.u32 2147483647, %v885_v56  ;;  %v899_v11 = vadd.s32 3, %v895_v61 }
 0x148   :  { %v597_v51 = vsel %vm586_vm9, nan, %v596_v37  ;;  %v1424_v57 = vsel %vm586_vm9, nan, %v1423_v49  ;;  %v2700_v2 = vshrl.u32 %v763_v46, 30  ;;  %v1724_v16 = vand.u32 3, %v895_v61 }
 0x149   :  { %v1738_v34 = vsel %vm77_vm13, %v597_v51, %v1424_v57  ;;  %v889_v60 = vmul.f32 %v888_v13, %v886_v45  ;;  %v900_v36 = vand.u32 3, %v899_v11  ;;  %vm898_vm12 = vweird.f32 %v2476_v30 }
 0x14a   :  { %1746 = vst [vmem:[#allocation2 + $0x20] sm:$0xff] %v1738_v34  ;;  %v765_v33 = vshll.u32 %v2700_v2, 30  ;;  %vm1725_vm6 = vcmp.lt.s32.totalorder %v1724_v16, 2  ;;  %vm1729_vm7 = vcmp.eq.s32.totalorder %v1724_v16, 2  ;;  %vm1726_vm11 = vcmp.eq.s32.totalorder %v1724_v16, 0 }
 0x14b   :  { %v890_v48 = vxor.u32 2147483648, %v889_v60  ;;  %vm905_vm8 = vcmp.eq.s32.totalorder %v900_v36, 2  ;;  %vm902_vm9 = vcmp.eq.s32.totalorder %v900_v36, 0  ;;  %vm901_vm10 = vcmp.lt.s32.totalorder %v900_v36, 2 }
 0x14c   :  { %v766_v50 = vsub.s32 %v762_v29, %v765_v33  ;;  %vm704_vm14 = vcmp.lt.s32.totalorder %v2543_v25, 0  ;;  %v788_v4 = vsub.s32 4, %v2700_v2  ;;  %vm703_vm15 = vcmp.le.f32.partialorder %v702_v63, 0.7853982 }
 0x14d   :  { %v891_v52 = vsel %vm808_vm3, %v890_v48, %v889_v60 }
 0x14e   :  { %v894_v27 = vsel %vm807_vm4, %v2476_v30, %v891_v52  ;;  %v768_v6 = vsub.s32 0, %v766_v50  ;;  %v789_v55 = vsel %vm704_vm14, %v788_v4, %v2700_v2 }
 0x14f   :  { %1899 = vcosq.f32 %v894_v27  ;;  %v791_v41 = vsel %vm703_vm15, 0, %v789_v55 }
 0x150   :  { %1901 = vsinq.f32 %v894_v27  ;;  %v1792_v10 = vmin.u32 %v768_v6, %v766_v50  ;;  %v795_v37 = vadd.s32 3, %v791_v41  ;;  %v1621_v62 = vand.u32 3, %v791_v41 }
 0x152   :  { %v770_v7 = vclz %v1792_v10  ;;  %v796_v49 = vand.u32 3, %v795_v37  ;;  %vm1626_vm1 = vcmp.eq.s32.totalorder %v1621_v62, 2  ;;  %vm1623_vm3 = vcmp.eq.s32.totalorder %v1621_v62, 0 }
 0x154   :  { %v1793_v15 = vadd.s32 4294967294, %v770_v7  ;;  %vm801_vm0 = vcmp.eq.s32.totalorder %v796_v49, 2  ;;  %vm798_vm2 = vcmp.eq.s32.totalorder %v796_v49, 0  ;;  %vm797_vm4 = vcmp.lt.s32.totalorder %v796_v49, 2 }
 0x156   :  { %vm1794_vm5 = vcmp.lt.s32.totalorder %v1793_v15, 0 }
 0x157   :  { %v773_v9 = vsel %vm1794_vm5, 0, %v1793_v15  ;;  %vm1622_vm5 = vcmp.lt.s32.totalorder %v1621_v62, 2 }
 0x158   :  { %v774_v43 = vsub.s32 32, %v773_v9  ;;  %v778_v39 = vsub.s32 4294967266, %v773_v9  ;;  %v775_v24 = vshll.u32 %v766_v50, %v773_v9 }
 0x15a   :  { %v776_v19 = vshrl.u32 %v758_v26, %v774_v43  ;;  %v779_v58 = vadd.s32 127, %v778_v39 }
 0x15c   :  { %v1900_v21 = vpop.eup %1899  ;;  %v777_v38 = vor.u32 %v776_v19, %v775_v24  ;;  %v780_v17 = vshll.u32 %v779_v58, 23 }
 0x15d   :  { %v1902_v44 = vpop.eup %1901  ;;  %v906_v1 = vxor.u32 2147483648, %v1900_v21 }
 0x15e   :  { %v903_v18 = vxor.u32 2147483648, %v1902_v44  ;;  %v781_v20 = vor.u32 4788187, %v780_v17  ;;  %v784_v23 = vcvt.s32.f32 %v777_v38 }
 0x15f   :  { %v907_v59 = vsel %vm905_vm8, %v906_v1, %v1902_v44  ;;  %v1731_v0 = vsel %vm1729_vm7, %v906_v1, %v1902_v44 }
 0x160   :  { %v904_v53 = vsel %vm902_vm9, %v1900_v21, %v903_v18  ;;  %v1728_v8 = vsel %vm1726_vm11, %v1900_v21, %v903_v18  ;;  %v782_v31 = vand.u32 2147483647, %v781_v20 }
 0x161   :  { %v908_v12 = vsel %vm901_vm10, %v904_v53, %v907_v59  ;;  %v1732_v5 = vsel %vm1725_vm6, %v1728_v8, %v1731_v0  ;;  %vm794_vm6 = vweird.f32 %v2543_v25 }
 0x162   :  { %v909_v14 = vsel %vm898_vm12, nan, %v908_v12  ;;  %v1733_v32 = vsel %vm898_vm12, nan, %v1732_v5  ;;  %v785_v40 = vmul.f32 %v784_v23, %v782_v31 }
 0x163   :  { %v1741_v47 = vsel %vm77_vm13, %v909_v14, %v1733_v32 }
 0x164   :  { %1749 = vst [vmem:[#allocation2 + $0x38] sm:$0xff] %v1741_v47  ;;  %v786_v42 = vxor.u32 2147483648, %v785_v40 }
 0x166   :  { %v787_v30 = vsel %vm704_vm14, %v786_v42, %v785_v40 }
 0x167   :  { %v790_v28 = vsel %vm703_vm15, %v2543_v25, %v787_v30 }
 0x168   :  { %1903 = vcosq.f32 %v790_v28 }
 0x169   :  { %1905 = vsinq.f32 %v790_v28 }
 0x175   :  { %v1904_v22 = vpop.eup %1903 }
 0x176   :  { %v1906_v51 = vpop.eup %1905  ;;  %v802_v57 = vxor.u32 2147483648, %v1904_v22 }
 0x177   :  { %v799_v56 = vxor.u32 2147483648, %v1906_v51 }
 0x178   :  { %v803_v63 = vsel %vm801_vm0, %v802_v57, %v1906_v51  ;;  %v1628_v34 = vsel %vm1626_vm1, %v802_v57, %v1906_v51 }
 0x179   :  { %v800_v29 = vsel %vm798_vm2, %v1904_v22, %v799_v56  ;;  %v1625_v45 = vsel %vm1623_vm3, %v1904_v22, %v799_v56 }
 0x17a   :  { %v804_v13 = vsel %vm797_vm4, %v800_v29, %v803_v63  ;;  %v1629_v46 = vsel %vm1622_vm5, %v1625_v45, %v1628_v34 }
 0x17b   :  { %v805_v60 = vsel %vm794_vm6, nan, %v804_v13  ;;  %v1630_v2 = vsel %vm794_vm6, nan, %v1629_v46 }
 0x17c   :  { %v1740_v48 = vsel %vm77_vm13, %v805_v60, %v1630_v2 }
 0x17d   :  { %1748 = vst [vmem:[#allocation2 + $0x30] sm:$0xff] %v1740_v48 }
 0x17e   :  { %1919 = shalt.err (!%p1916_p4)
}
 0x17f   :  { %s1938_s30 = smov 128   ;;  %s1939_s3 = smov 8  }
 0x180   :  { %1761 = dma.vmem_to_hbm [thread:$0]  %s1756_s28, 1024, %s2729_s2, [#allocation3], %s1938_s30, %s1938_s30, %s1939_s3  }
 0x181   :  { %1928 = dma.done.wait [#allocation3], 1024  }
 0x182   :  { %1929 = vsyncadd [#allocation3], 4294966272 }
 0x183   :  { %1765 = vsyncpa [#allocation3], 1 }

</bundles_post_ra>
